<compile_context>
chip_gen: v7x
topology: tpu7x:2x2x1
jax: 0.10.0
libtpu: 0.0.40
codegen_flags: <defaults>
</compile_context>

<pallas_src>
import functools

import jax
import jax.numpy as jnp
from jax import lax
from jax.experimental import pallas as pl
from jax.experimental.pallas import tpu as pltpu


# --------------------------------------------------------------------------- #
# shared epilogue: scale + optional F.normalize(p=2, dim=-1, eps=1e-12)
# --------------------------------------------------------------------------- #
def _finalize(rows_f32, scale, l2norm_embed):
    rows = rows_f32
    if scale != 1.0:
        rows = rows * jnp.float32(scale)
    if l2norm_embed:
        # t / max(||t||, eps)  ==  t * rsqrt(max(sumsq, eps^2))
        sumsq = jnp.sum(rows * rows, axis=-1, keepdims=True)
        rows = rows * lax.rsqrt(jnp.maximum(sumsq, jnp.float32(1e-24)))
    return rows


# --------------------------------------------------------------------------- #
# kernels
# --------------------------------------------------------------------------- #
def _contig_kernel(emb_ref, out_ref, *, scale, l2norm_embed):
    # pos == arange: the "gather" is the t-th contiguous (ts, dim) tile of the table.
    rows = _finalize(emb_ref[...].astype(jnp.float32), scale, l2norm_embed)
    out_ref[...] = rows.astype(out_ref.dtype)


def _take_kernel(pos_ref, emb_ref, out_ref, *, scale, l2norm_embed, cast_table):
    # pos_ref: (ts, 1) int32 block of indices (VMEM)
    # emb_ref: (max_seq_len, dim) full table, VMEM-resident (constant block index)
    idx = pos_ref[:, 0]                       # (ts,) int32 row indices
    table = emb_ref[...]
    if cast_table:                            # gather on 32-bit elements
        table = table.astype(jnp.float32)
    rows = jnp.take(table, idx, axis=0, mode="clip")
    out_ref[...] = _finalize(rows.astype(jnp.float32), scale, l2norm_embed).astype(
        out_ref.dtype)


def _dma_gather_kernel(pos_smem, emb_hbm, out_ref, buf, sem, *,
                       scale, l2norm_embed, ts):
    # Fallback for tables too large for VMEM: per-row DMA gather from HBM.
    # pos_smem: (num_tiles*ts,) int32 indices, scalar-prefetched into SMEM
    # emb_hbm : raw HBM ref (max_seq_len, dim)
    # buf     : VMEM (ts, dim) scratch; sem: single DMA semaphore
    base = pl.program_id(0) * ts

    def _start(r, carry):
        idx = pos_smem[base + r]
        pltpu.make_async_copy(emb_hbm.at[pl.ds(idx, 1), :],
                              buf.at[pl.ds(r, 1), :],
                              sem).start()
        return carry

    # Unrolled issue loop: overlap index scalar-loads with descriptor pushes.
    lax.fori_loop(0, ts, _start, 0, unroll=8)

    # Single bulk wait: all ts row copies signal the same semaphore; waiting with a
    # (ts, dim)-sized descriptor waits for the full ts*dim*itemsize bytes at once.
    pltpu.make_async_copy(emb_hbm.at[pl.ds(0, ts), :], buf, sem).wait()

    rows = _finalize(buf[...].astype(jnp.float32), scale, l2norm_embed)
    out_ref[...] = rows.astype(out_ref.dtype)


# --------------------------------------------------------------------------- #
# wrapper
# --------------------------------------------------------------------------- #
def _choose_tile(seq_len, dim, itemsize, sub, target_bytes, max_rows=2048):
    rows = target_bytes // max(1, dim * itemsize)
    rows = max(sub, min(int(rows), max_rows))
    rows = (rows // sub) * sub
    seq_rounded = -(-seq_len // sub) * sub
    return max(sub, min(rows, seq_rounded))


def absolute_positional_embedding(x, emb, *, max_seq_len=None, pos=None,
                                  l2norm_embed=False,
                                  table_vmem_budget_bytes=12 * 1024 * 1024):
    """Pallas implementation of AbsolutePositionalEmbedding.forward.

    x:   (B, S, ...) — only S = x.shape[1] is used (as in the PyTorch module).
    emb: (max_seq_len, dim) embedding table.
    pos: optional (S,) int indices into the table.
    Returns (S, dim) positional embeddings, dtype of `emb`.
    """
    seq_len = x.shape[1]
    n_emb, dim = emb.shape
    if max_seq_len is None:
        max_seq_len = n_emb
    assert seq_len <= max_seq_len, (
        f"sequence length {seq_len} > max_seq_len {max_seq_len}")

    scale = 1.0 if l2norm_embed else dim ** (-0.5)
    itemsize = jnp.dtype(emb.dtype).itemsize
    sub = {4: 8, 2: 16, 1: 32}.get(itemsize, 8)     # sublane multiple per dtype

    out_shape = jax.ShapeDtypeStruct((seq_len, dim), emb.dtype)

    # ------------------------------------------------------------------ #
    # Fast path: pos is None -> contiguous tiles of the table.
    # ------------------------------------------------------------------ #
    if pos is None:
        ts = _choose_tile(seq_len, dim, itemsize, sub, target_bytes=3 << 19)
        num_tiles = pl.cdiv(seq_len, ts)
        kernel = functools.partial(_contig_kernel, scale=scale,
                                   l2norm_embed=l2norm_embed)
        return pl.pallas_call(
            kernel,
            out_shape=out_shape,
            grid_spec=pltpu.PrefetchScalarGridSpec(
                num_scalar_prefetch=0,
                grid=(num_tiles,),
                in_specs=[pl.BlockSpec((ts, dim), lambda t: (t, 0))],
                out_specs=pl.BlockSpec((ts, dim), lambda t: (t, 0)),
            ),
            compiler_params=pltpu.CompilerParams(
                dimension_semantics=("parallel",)),
        )(emb)

    # ------------------------------------------------------------------ #
    # Explicit pos.
    # ------------------------------------------------------------------ #
    pos = jnp.asarray(pos).astype(jnp.int32)
    assert pos.shape == (seq_len,), "pos must be a 1-D (seq_len,) index array"

    cast_table = itemsize != 4                      # gather on 32-bit elements
    table_gather_bytes = n_emb * dim * 4 if cast_table else n_emb * dim * itemsize
    use_take = table_gather_bytes <= table_vmem_budget_bytes

    ts = _choose_tile(seq_len, dim, itemsize, sub, target_bytes=1 << 20)
    num_tiles = pl.cdiv(seq_len, ts)
    padded = num_tiles * ts

    if use_take:
        # Whole table VMEM-resident (constant block index -> DMA'd once),
        # vectorized in-register gather per output tile.
        pos_pad = jnp.zeros((padded, 1), jnp.int32).at[:seq_len, 0].set(pos)
        kernel = functools.partial(_take_kernel, scale=scale,
                                   l2norm_embed=l2norm_embed,
                                   cast_table=cast_table)
        table_bytes = n_emb * dim * itemsize
        vmem_need = (2 * table_bytes
                     + (table_gather_bytes if cast_table else 0)
                     + 2 * ts * dim * itemsize
                     + 2 * ts * 4
                     + (2 << 20))
        return pl.pallas_call(
            kernel,
            out_shape=out_shape,
            grid_spec=pltpu.PrefetchScalarGridSpec(
                num_scalar_prefetch=0,
                grid=(num_tiles,),
                in_specs=[pl.BlockSpec((ts, 1), lambda t: (t, 0)),
                          pl.BlockSpec((n_emb, dim), lambda t: (0, 0))],
                out_specs=pl.BlockSpec((ts, dim), lambda t: (t, 0)),
            ),
            compiler_params=pltpu.CompilerParams(
                dimension_semantics=("parallel",),
                vmem_limit_bytes=int(max(vmem_need, 32 << 20))),
        )(pos_pad, emb)

    # Fallback: table too large for VMEM -> per-row DMA gather from HBM.
    pos_pad = jnp.zeros((padded,), jnp.int32).at[:seq_len].set(pos)
    kernel = functools.partial(_dma_gather_kernel, scale=scale,
                               l2norm_embed=l2norm_embed, ts=ts)
    return pl.pallas_call(
        kernel,
        out_shape=out_shape,
        grid_spec=pltpu.PrefetchScalarGridSpec(
            num_scalar_prefetch=1,
            grid=(num_tiles,),
            in_specs=[pl.BlockSpec(memory_space=pl.ANY)],
            out_specs=pl.BlockSpec((ts, dim), lambda t, pos_r: (t, 0)),
            scratch_shapes=[pltpu.VMEM((ts, dim), emb.dtype),
                            pltpu.SemaphoreType.DMA],
        ),
        compiler_params=pltpu.CompilerParams(
            dimension_semantics=("parallel",)),
    )(pos_pad, emb)


# --------------------------------------------------------------------------- #
# smoke test
# --------------------------------------------------------------------------- #
if __name__ == "__main__":
    key = jax.random.PRNGKey(0)
    k_emb, k_x = jax.random.split(key)

    B, S = 2, 16
    dim, max_seq_len = 128, 64

    emb = jax.random.normal(k_emb, (max_seq_len, dim), dtype=jnp.float32) * 0.02
    x = jax.random.randint(k_x, (B, S), 0, 1000)   # only x.shape[1] is used

    # --- default path: pos=None, l2norm_embed=False (scale = dim**-0.5) -----
    out = absolute_positional_embedding(x, emb, max_seq_len=max_seq_len)
    out = jax.block_until_ready(out)
    ref = emb[:S] * jnp.float32(dim ** (-0.5))
    assert out.shape == (S, dim)
    assert jnp.allclose(out, ref, atol=1e-5, rtol=1e-5), "mismatch (contiguous path)"

    # --- explicit pos + l2norm_embed=True (VMEM-table jnp.take path) --------
    pos = (jnp.arange(S, dtype=jnp.int32) * 7 + 3) % max_seq_len
    out2 = absolute_positional_embedding(x, emb, max_seq_len=max_seq_len,
                                         pos=pos, l2norm_embed=True)
    out2 = jax.block_until_ready(out2)
    rows = emb[pos]
    norm = jnp.sqrt(jnp.sum(rows * rows, axis=-1, keepdims=True))
    ref2 = rows / jnp.maximum(norm, 1e-12)
    assert out2.shape == (S, dim)
    assert jnp.allclose(out2, ref2, atol=1e-5, rtol=1e-5), "mismatch (take path)"

    # --- forced per-row-DMA fallback (pretend table does not fit VMEM) ------
    out3 = absolute_positional_embedding(x, emb, max_seq_len=max_seq_len,
                                         pos=pos, l2norm_embed=False,
                                         table_vmem_budget_bytes=0)
    out3 = jax.block_until_ready(out3)
    ref3 = emb[pos] * jnp.float32(dim ** (-0.5))
    assert out3.shape == (S, dim)
    assert jnp.allclose(out3, ref3, atol=1e-5, rtol=1e-5), "mismatch (DMA fallback)"

    print("KERNEL_OK")
</pallas_src>

<mosaic_0001>
module attributes {stable_mosaic.version = 11 : i64} {
  func.func @_contig_kernel(%arg0: i32, %arg1: memref<16x128xf32, #tpu.memory_space<vmem>>, %arg2: memref<16x128xf32, #tpu.memory_space<vmem>>) attributes {dimension_semantics = [#tpu.dimension_semantics<parallel>], iteration_bounds = array<i64: 1>, scalar_prefetch = 0 : i64, scratch_operands = 0 : i64, tpu.core_type = #tpu.core_type<tc>, window_params = [{transform_indices = @transform_0, window_bounds = array<i64: 16, 128>}, {transform_indices = @transform_1, window_bounds = array<i64: 16, 128>}]} {
    %c0 = arith.constant 0 : index
    %c0_0 = arith.constant 0 : index
    %0 = vector.load %arg1[%c0, %c0_0] : memref<16x128xf32, #tpu.memory_space<vmem>>, vector<16x128xf32>
    %cst = arith.constant 0.0883883461 : f32
    %1 = vector.broadcast %cst : f32 to vector<16x128xf32>
    %2 = arith.mulf %0, %1 : vector<16x128xf32>
    %c0_1 = arith.constant 0 : index
    %c0_2 = arith.constant 0 : index
    %3 = vector.load %arg2[%c0_1, %c0_2] : memref<16x128xf32, #tpu.memory_space<vmem>>, vector<16x128xf32>
    tpu.vector_store %arg2[%c0_1, %c0_2], %2 {strides = array<i32>} : memref<16x128xf32, #tpu.memory_space<vmem>>, vector<16x128xf32>,
    return
  }
  func.func @transform_0(%arg0: i32) -> (i32, i32) {
    %c0_i32 = arith.constant 0 : i32
    %c0_i32_0 = arith.constant 0 : i32
    return %arg0, %c0_i32 : i32, i32
  }
  func.func @transform_1(%arg0: i32) -> (i32, i32) {
    %c0_i32 = arith.constant 0 : i32
    %c0_i32_0 = arith.constant 0 : i32
    return %arg0, %c0_i32 : i32, i32
  }
}

</mosaic_0001>

<bundles_post_ra>
// kernel: tpu_custom_call.1
= control target key start
LH: loop header
LB: loop body
LE: loop exit
PB: predicated region body
PF: predicated region fallthrough
CT: control target
= control target key end

     0   :  { %6 = vsyncpa [#allocation3], 0  ;;  %s139_s0 = inlined_call_operand.hbm [shape: f32[64,128], index: 0, kind: input, shape index: {}]   ;;  %s140_s1 = inlined_call_operand.hbm [shape: f32[16,128], index: 1, kind: output, shape index: {}]  }
   0x1   :  { %7 = vsyncpa [#allocation4], 0  ;;  %s98_s6 = smov [#allocation2]   ;;  %s50_s10 = scalar_lea.hbm %s139_s0, 256 }
   0x2   :  { %s13_s7 = sshll.u32 %s98_s6, 4  ;;  %p51_p0 = scmp.ne.s32.totalorder %s139_s0, %s50_s10  ;;  %s14_s7 = int_to_ptr.vmem [resolvable:$true] %s13_s7 }
   0x3   :  { %s52_s15 = scalar_lea.hbm %s139_s0, 1024  ;;  %p54_p2 = scmp.lt.u32.totalorder %s50_s10, %s139_s0 }
   0x4   :  { %p53_p1 = scmp.lt.u32.totalorder %s52_s15, %s50_s10 }
   0x6   :  { %p55_p3 = por %p54_p2, %p53_p1 }
   0x8   :  { %p56_p4 = pnand %p55_p3, %p51_p0 }
   0xa   :  { %59 = shalt.err (!%p56_p4)
}
   0xb   :  { %s60_s18 = scalar_lea.vmem %s14_s7, 256  ;;  %p65_p6 = scmp.lt.s32.totalorder %s14_s7, %s14_s7 }
   0xc   :  { %p61_p5 = scmp.ne.s32.totalorder %s14_s7, %s60_s18  ;;  %p66_p7 = scmp.lt.s32.totalorder %s60_s18, %s60_s18 }
   0xe   :  { %p67_p8 = por %p66_p7, %p65_p6 }
  0x10   :  { %p68_p9 = pnand %p67_p8, %p61_p5 }
  0x12   :  { %71 = shalt.err (!%p68_p9)
}
  0x13   :  { %s99_s19 = smov 128   ;;  %s100_s20 = smov 8  }
  0x14   :  { %19 = dma.hbm_to_vmem [thread:$0]  %s139_s0, 256, %s14_s7, [#allocation3], %s99_s19, %s99_s19, %s100_s20  }
  0x15   :  { %94 = dma.done.wait [#allocation3], 256  }
  0x16   :  { %95 = vsyncadd [#allocation3], 4294967040  ;;  %s101_s23 = smov [#allocation5]   ;;  %v23_v0 = vld [vmem:[#allocation2] sm:$0xff]  ;;  %v24_v1 = vld [vmem:[#allocation2 + $0x8] sm:$0xff] }
  0x17   :  { %s34_s24 = sshll.u32 %s101_s23, 4  ;;  %v25_v2 = vmul.f32 0.088388346, %v23_v0  ;;  %v26_v3 = vmul.f32 0.088388346, %v24_v1  ;;  %s35_s24 = int_to_ptr.vmem [resolvable:$true] %s34_s24 }
  0x18   :  { %s72_s25 = scalar_lea.vmem %s35_s24, 256  ;;  %p77_p11 = scmp.lt.s32.totalorder %s35_s24, %s35_s24 }
  0x19   :  { %27 = vst [vmem:[#allocation5] sm:$0xff] %v25_v2  ;;  %28 = vst [vmem:[#allocation5 + $0x8] sm:$0xff] %v26_v3  ;;  %p73_p10 = scmp.ne.s32.totalorder %s35_s24, %s72_s25  ;;  %p78_p12 = scmp.lt.s32.totalorder %s72_s25, %s72_s25 }
  0x1b   :  { %p79_p13 = por %p78_p12, %p77_p11 }
  0x1d   :  { %p80_p0 = pnand %p79_p13, %p73_p10 }
  0x1f   :  { %83 = shalt.err (!%p80_p0)
}
  0x20   :  { %s84_s27 = scalar_lea.hbm %s140_s1, 256 }
  0x21   :  { %p85_p1 = scmp.ne.s32.totalorder %s140_s1, %s84_s27  ;;  %p88_p2 = scmp.lt.u32.totalorder %s84_s27, %s140_s1 }
  0x23   :  { %p90_p3 = pnand %p88_p2, %p85_p1 }
  0x25   :  { %93 = shalt.err (!%p90_p3)
}
  0x26   :  { %40 = dma.vmem_to_hbm [thread:$0]  %s35_s24, 256, %s140_s1, [#allocation4], %s99_s19, %s99_s19, %s100_s20  }
  0x27   :  { %96 = dma.done.wait [#allocation4], 256  }
  0x28   :  { %97 = vsyncadd [#allocation4], 4294967040 }
  0x29   :  { %44 = vsyncpa [#allocation3], 1 }
  0x2a   :  { %45 = vsyncpa [#allocation4], 1 }

</bundles_post_ra>
